<compile_context>
chip_gen: v5e
topology: v5e:2x2
jax: 0.10.0
libtpu: 0.0.40
codegen_flags: <defaults>
</compile_context>

<pallas_src>
import math

import numpy as np
import jax
import jax.numpy as jnp
from jax import lax
from jax.experimental import pallas as pl
from jax.experimental.pallas import tpu as pltpu

# ---- static config (mirrors DeforAttn defaults: num_heads=1, num_points=4,
#      agent_names=['ego'], feature_levels=[3], lora_rank=0 -> plain Linear) ----
EMBED_DIMS = 32
NUM_HEADS = 1
NUM_POINTS = 4
FEATURE_LEVELS = [3]
L_TOTAL = sum(FEATURE_LEVELS)
HEAD_DIM = EMBED_DIMS // NUM_HEADS
LP = L_TOTAL * NUM_POINTS          # sampling points per head
HLP = NUM_HEADS * LP               # sampling points, all heads


# --------------------------------------------------------------------------- #
# Kernel 1: value projection (grid-invariant — run ONCE, not per query block). #
# --------------------------------------------------------------------------- #
def _value_proj_kernel(v_ref, w_ref, b_ref, o_ref):
    o_ref[...] = (jnp.dot(v_ref[...], w_ref[...],
                          preferred_element_type=jnp.float32) + b_ref[...])


# --------------------------------------------------------------------------- #
# Kernel 2: deformable attention over query blocks.                            #
# --------------------------------------------------------------------------- #
def _make_attn_kernel(nv, block_q):
    H, P, L, D = NUM_HEADS, NUM_POINTS, L_TOTAL, HEAD_DIM
    f32 = jnp.float32

    def kernel(q_ref, qp_ref, v_ref, bx_ref, by_ref, lvl_ref,
               wq_ref, bq_ref, wo_ref, bo_ref, o_ref):
        q = q_ref[...] + qp_ref[...]                                       # [BQ, C]

        # Fused sampling-offset + attention-weight projection (one MXU pass).
        # Wrapper reordered weight columns to [all x-off | all y-off | logits].
        proj = jnp.dot(q, wq_ref[...], preferred_element_type=f32) + bq_ref[...]
        off_x_all = proj[:, 0:HLP]
        off_y_all = proj[:, HLP:2 * HLP]
        logits_all = proj[:, 2 * HLP:3 * HLP]

        # Static per-point level constants, prebuilt in the wrapper: [3, LP].
        w_f = lvl_ref[0:1, :]        # W_l per point (f32)
        h_f = lvl_ref[1:2, :]        # H_l per point
        s_f = lvl_ref[2:3, :]        # level start index per point

        iota_v = lax.broadcasted_iota(jnp.int32, (block_q, nv), 1).astype(f32)

        head_outs = []
        for h in range(H):
            sl = slice(h * LP, (h + 1) * LP)
            off_x = off_x_all[:, sl]
            off_y = off_y_all[:, sl]
            logits = logits_all[:, sl]

            # per-head softmax over all L*P sampling points (divide on the EUP slot)
            m = jnp.max(logits, axis=-1, keepdims=True)
            e = jnp.exp(logits - m)
            aw = e * pl.reciprocal(jnp.sum(e, axis=-1, keepdims=True), approx=True)

            # pixel coords for all L*P points at once (grid_sample, align_corners=False):
            # (ref + off/W)*W - 0.5 == (ref*W - 0.5) + off, base precomputed in wrapper.
            x = bx_ref[...] + off_x                                        # [BQ, LP]
            y = by_ref[...] + off_y
            x0 = jnp.floor(x)
            y0 = jnp.floor(y)
            fx = x - x0
            fy = y - y0

            # Bilinear gather expressed as one-hot select-accumulate so the value
            # reduction runs on the MXU (S @ v).  Four independent partial-S buffers
            # (one per corner) break the long loop-carried add chain.
            s_parts = [jnp.zeros((block_q, nv), f32) for _ in range(4)]
            for c, (dy, dx) in enumerate(((0, 0), (0, 1), (1, 0), (1, 1))):
                xi = x0 + float(dx)
                yi = y0 + float(dy)
                wx = fx if dx else 1.0 - fx
                wy = fy if dy else 1.0 - fy
                valid = (xi >= 0.0) & (xi < w_f) & (yi >= 0.0) & (yi < h_f)  # zero pad
                w_c = jnp.where(valid, aw * (wx * wy), 0.0)                # [BQ, LP]
                xi_c = jnp.clip(xi, 0.0, w_f - 1.0)
                yi_c = jnp.clip(yi, 0.0, h_f - 1.0)
                idx_c = s_f + yi_c * w_f + xi_c       # flat value index, exact in f32
                acc = s_parts[c]
                for j in range(LP):
                    acc = acc + jnp.where(iota_v == idx_c[:, j:j + 1],
                                          w_c[:, j:j + 1], 0.0)
                s_parts[c] = acc
            S = (s_parts[0] + s_parts[1]) + (s_parts[2] + s_parts[3])      # [BQ, nv]

            # TODO(synk): at production nv, replace this dense S @ v with an nv-tiled
            # grid axis or a DMA gather, and cast MXU operands to bf16.
            head_outs.append(jnp.dot(S, v_ref[:, h * D:(h + 1) * D],
                                     preferred_element_type=f32))

        attn = head_outs[0] if H == 1 else jnp.concatenate(head_outs, axis=-1)  # [BQ, C]

        out = jnp.dot(attn, wo_ref[...], preferred_element_type=f32) + bo_ref[...]
        # TODO(synk): nn.Dropout(0.1) is treated as eval-mode identity (inference only).
        o_ref[...] = out + q_ref[...]        # residual with identity = query (no pos)

    return kernel


def defor_attn(query, query_pos, value, reference_points, spatial_shapes, params,
               block_q=None):
    """query/query_pos: [1, nq, C]; value: [1, nv, C]; reference_points: [1, nq, L, 2];
    spatial_shapes: STATIC python/numpy [L, 2] of (H_l, W_l)."""
    shapes = np.asarray(spatial_shapes, dtype=np.int64)
    assert shapes.shape == (L_TOTAL, 2)
    hs = [int(x) for x in shapes[:, 0]]
    ws = [int(x) for x in shapes[:, 1]]
    sizes = [h * w for h, w in zip(hs, ws)]
    starts = [0] + list(np.cumsum(sizes)[:-1])
    nv = int(sum(sizes))

    q = query[0].astype(jnp.float32)
    qp = query_pos[0].astype(jnp.float32)
    v2d = value[0].astype(jnp.float32)
    nq, C = q.shape
    assert v2d.shape == (nv, C)

    # ---- value projection: grid-invariant, so do it once in its own tiny kernel ----
    full = lambda i: (0, 0)
    v_proj = pl.pallas_call(
        _value_proj_kernel,
        out_shape=jax.ShapeDtypeStruct((nv, C), jnp.float32),
        grid=(1,),
        in_specs=[pl.BlockSpec((nv, C), full),
                  pl.BlockSpec((C, C), full),
                  pl.BlockSpec((1, C), full)],
        out_specs=pl.BlockSpec((nv, C), full),
    )(v2d, params["w_value"].astype(jnp.float32), params["b_value"].astype(jnp.float32))

    # ---- pixel-space base coords (layout plumbing): [nq, L*P], layout (l, p) ----
    P = NUM_POINTS
    ref = reference_points[0].astype(jnp.float32)                       # [nq, L, 2]
    w_row = jnp.asarray(np.asarray(ws, np.float32))[None, :]            # [1, L]
    h_row = jnp.asarray(np.asarray(hs, np.float32))[None, :]
    base_x = jnp.repeat(ref[:, :, 0] * w_row - 0.5, P, axis=1)          # [nq, LP]
    base_y = jnp.repeat(ref[:, :, 1] * h_row - 0.5, P, axis=1)

    # ---- static per-point level constants table: [3, LP] (W_l, H_l, level_start) ----
    lvl_of = np.arange(LP) // P
    lvl_tbl = jnp.asarray(np.stack([
        np.asarray([ws[l] for l in lvl_of], np.float32),
        np.asarray([hs[l] for l in lvl_of], np.float32),
        np.asarray([starts[l] for l in lvl_of], np.float32),
    ], axis=0))

    # ---- fused query projection: [all x-offsets | all y-offsets | aw logits] ----
    # Original w_so column layout is (h, l, p, xy) with xy fastest.
    x_cols = np.arange(HLP) * 2
    y_cols = x_cols + 1
    w_q = jnp.concatenate([params["w_so"][:, x_cols],
                           params["w_so"][:, y_cols],
                           params["w_aw"]], axis=1).astype(jnp.float32)   # [C, 3*HLP]
    b_q = jnp.concatenate([params["b_so"][:, x_cols],
                           params["b_so"][:, y_cols],
                           params["b_aw"]], axis=1).astype(jnp.float32)   # [1, 3*HLP]

    # Single grid step by default (best on single-TC v5e/v6e); pass a divisor of nq
    # (e.g. nq // 2) on v7x so the "parallel" grid axis shards across both TensorCores.
    if block_q is None:
        block_q = nq
    assert nq % block_q == 0
    assert block_q == nq or block_q % 8 == 0
    grid = (nq // block_q,)

    kernel = _make_attn_kernel(nv, block_q)
    qblk = lambda i: (i, 0)

    out = pl.pallas_call(
        kernel,
        out_shape=jax.ShapeDtypeStruct((nq, C), jnp.float32),
        grid=grid,
        in_specs=[
            pl.BlockSpec((block_q, C), qblk),       # query
            pl.BlockSpec((block_q, C), qblk),       # query_pos
            pl.BlockSpec((nv, C), full),            # projected value (grid-invariant)
            pl.BlockSpec((block_q, LP), qblk),      # base_x (ref_x*W - 0.5 per point)
            pl.BlockSpec((block_q, LP), qblk),      # base_y (ref_y*H - 0.5 per point)
            pl.BlockSpec((3, LP), full),            # per-point level constants
            pl.BlockSpec((C, 3 * HLP), full),       # fused w_so|w_aw
            pl.BlockSpec((1, 3 * HLP), full),       # fused b_so|b_aw
            pl.BlockSpec((C, C), full),             # w_out
            pl.BlockSpec((1, C), full),             # b_out
        ],
        out_specs=pl.BlockSpec((block_q, C), qblk),
        compiler_params=pltpu.CompilerParams(
            dimension_semantics=("parallel",)),
    )(q, qp, v_proj, base_x, base_y, lvl_tbl, w_q, b_q,
      params["w_out"].astype(jnp.float32), params["b_out"].astype(jnp.float32))
    return out[None]  # [1, nq, C]


def defor_attn_ref(query, query_pos, value, reference_points, spatial_shapes, params):
    """Pure-JAX reference of the PyTorch forward (eval mode) for tolerance checks."""
    H, P, L, D, C = NUM_HEADS, NUM_POINTS, L_TOTAL, HEAD_DIM, EMBED_DIMS
    q = (query[0] + query_pos[0]).astype(jnp.float32)                   # [nq, C]
    nq = q.shape[0]
    v = value[0].astype(jnp.float32) @ params["w_value"] + params["b_value"]
    v = v.reshape(-1, H, D)

    off = (q @ params["w_so"] + params["b_so"]).reshape(nq, H, L, P, 2)
    logits = (q @ params["w_aw"] + params["b_aw"]).reshape(nq, H, L * P)
    aw = jax.nn.softmax(logits, axis=-1).reshape(nq, H, L, P)

    shapes = np.asarray(spatial_shapes, np.int64)
    sizes = shapes[:, 0] * shapes[:, 1]
    starts = np.concatenate([[0], np.cumsum(sizes)[:-1]])
    ref = reference_points[0].astype(jnp.float32)                       # [nq, L, 2]

    out = jnp.zeros((nq, H, D), jnp.float32)
    for l in range(L):
        Hl, Wl = int(shapes[l, 0]), int(shapes[l, 1])
        s0 = int(starts[l])
        x = ref[:, l, 0][:, None, None] * Wl - 0.5 + off[:, :, l, :, 0]  # [nq, H, P]
        y = ref[:, l, 1][:, None, None] * Hl - 0.5 + off[:, :, l, :, 1]
        x0 = jnp.floor(x)
        y0 = jnp.floor(y)
        fx = x - x0
        fy = y - y0
        sampled = jnp.zeros((nq, H, P, D), jnp.float32)
        for dy, dx in ((0, 0), (0, 1), (1, 0), (1, 1)):
            xi = x0 + dx
            yi = y0 + dy
            wgt = (fx if dx else 1.0 - fx) * (fy if dy else 1.0 - fy)
            valid = (xi >= 0) & (xi < Wl) & (yi >= 0) & (yi < Hl)
            xc = jnp.clip(xi, 0, Wl - 1).astype(jnp.int32)
            yc = jnp.clip(yi, 0, Hl - 1).astype(jnp.int32)
            flat = yc * Wl + xc                                          # [nq, H, P]
            for h in range(H):
                g = v[s0:s0 + Hl * Wl, h][flat[:, h]]                    # [nq, P, D]
                w_c = jnp.where(valid[:, h], wgt[:, h], 0.0)             # [nq, P]
                sampled = sampled.at[:, h].add(w_c[:, :, None] * g)
        out = out + jnp.sum(aw[:, :, l, :, None] * sampled, axis=2)

    out = out.reshape(nq, C) @ params["w_out"] + params["b_out"]
    return (out + query[0].astype(jnp.float32))[None]


def init_params(key):
    """Deterministic synthetic init. Sampling-offset bias follows DeforAttn.init_weights'
    grid_init; linear weights are small random normals so every matmul path is exercised."""
    C, H, P, L = EMBED_DIMS, NUM_HEADS, NUM_POINTS, L_TOTAL
    ks = jax.random.split(key, 4)

    thetas = jnp.arange(H, dtype=jnp.float32) * (2.0 * math.pi / H)
    grid = jnp.stack([jnp.cos(thetas), jnp.sin(thetas)], -1)                       # (H, 2)
    grid = grid / jnp.max(jnp.abs(grid), axis=-1, keepdims=True)
    grid = jnp.tile(grid.reshape(H, 1, 1, 2), (1, 1, P, 1))                        # (H, 1, P, 2)
    grid = grid * jnp.arange(1, P + 1, dtype=jnp.float32).reshape(1, 1, P, 1)
    grid = jnp.tile(grid, (1, L, 1, 1))                                            # (H, L, P, 2)
    b_so = grid.reshape(1, H * L * P * 2)

    scale = 0.02
    return {
        "w_value": jax.random.normal(ks[0], (C, C), jnp.float32) * scale,
        "b_value": jnp.zeros((1, C), jnp.float32),
        "w_so":    jax.random.normal(ks[1], (C, H * L * P * 2), jnp.float32) * scale,
        "b_so":    b_so,
        "w_aw":    jax.random.normal(ks[2], (C, H * L * P), jnp.float32) * scale,
        "b_aw":    jnp.zeros((1, H * L * P), jnp.float32),
        "w_out":   jax.random.normal(ks[3], (C, C), jnp.float32) * scale,
        "b_out":   jnp.zeros((1, C), jnp.float32),
    }


if __name__ == "__main__":
    key = jax.random.PRNGKey(0)
    k1, k2, k3, k4, kp = jax.random.split(key, 5)

    # 3 feature levels (feature_levels=[3]): (8,8), (4,4), (2,2)  -> num_value = 84
    spatial_shapes = [(8, 8), (4, 4), (2, 2)]
    nv = sum(h * w for h, w in spatial_shapes)
    nq = 64  # query grid 8x8
    C = EMBED_DIMS

    query = jax.random.normal(k1, (1, nq, C), jnp.float32)
    query_pos = jax.random.normal(k2, (1, nq, C), jnp.float32)
    value = jax.random.normal(k3, (1, nv, C), jnp.float32)
    reference_points = jax.random.uniform(k4, (1, nq, L_TOTAL, 2), jnp.float32)
    params = init_params(kp)

    ref_out = defor_attn_ref(query, query_pos, value, reference_points,
                             spatial_shapes, params)

    # Default config: block_q = nq, grid=(1,)  -> no pipeline overhead on single-TC chips.
    out = defor_attn(query, query_pos, value, reference_points, spatial_shapes, params)
    out = jax.block_until_ready(out)
    assert out.shape == (1, nq, C) and out.dtype == jnp.float32
    err = float(jnp.max(jnp.abs(out - ref_out)))
    assert err < 5e-3, f"single-block max abs err {err}"

    # Split config (what you'd use on v7x so the 'parallel' grid feeds both TensorCores).
    out2 = defor_attn(query, query_pos, value, reference_points, spatial_shapes,
                      params, block_q=32)
    out2 = jax.block_until_ready(out2)
    err2 = float(jnp.max(jnp.abs(out2 - ref_out)))
    assert err2 < 5e-3, f"two-block max abs err {err2}"

    print("KERNEL_OK")
</pallas_src>

<mosaic_0001>
module attributes {stable_mosaic.version = 11 : i64} {
  func.func @_value_proj_kernel(%arg0: i32, %arg1: memref<84x32xf32, #tpu.memory_space<vmem>>, %arg2: memref<32x32xf32, #tpu.memory_space<vmem>>, %arg3: memref<1x32xf32, #tpu.memory_space<vmem>>, %arg4: memref<84x32xf32, #tpu.memory_space<vmem>>) attributes {dimension_semantics = [#tpu.dimension_semantics<arbitrary>], iteration_bounds = array<i64: 1>, scalar_prefetch = 0 : i64, scratch_operands = 0 : i64, tpu.core_type = #tpu.core_type<tc>, window_params = [{pipeline_mode = #tpu.pipeline_mode<synchronous>, transform_indices = @transform_0, window_bounds = array<i64: 84, 32>}, {pipeline_mode = #tpu.pipeline_mode<synchronous>, transform_indices = @transform_1, window_bounds = array<i64: 32, 32>}, {pipeline_mode = #tpu.pipeline_mode<synchronous>, transform_indices = @transform_2, window_bounds = array<i64: 1, 32>}, {pipeline_mode = #tpu.pipeline_mode<synchronous>, transform_indices = @transform_3, window_bounds = array<i64: 84, 32>}]} {
    %c0 = arith.constant 0 : index
    %c0_0 = arith.constant 0 : index
    %0 = vector.load %arg1[%c0, %c0_0] : memref<84x32xf32, #tpu.memory_space<vmem>>, vector<84x32xf32>
    %c0_1 = arith.constant 0 : index
    %c0_2 = arith.constant 0 : index
    %1 = vector.load %arg2[%c0_1, %c0_2] : memref<32x32xf32, #tpu.memory_space<vmem>>, vector<32x32xf32>
    %cst = arith.constant dense<0.000000e+00> : vector<84x32xf32>
    %2 = tpu.matmul %0, %1, %cst {dimension_numbers = #tpu.dot_dimension_numbers<[1], [0], [0], [1], [0, 0, 1, 1], [], []>} : vector<84x32xf32>, vector<32x32xf32>, vector<84x32xf32> -> vector<84x32xf32>
    %c0_3 = arith.constant 0 : index
    %c0_4 = arith.constant 0 : index
    %3 = vector.load %arg3[%c0_3, %c0_4] : memref<1x32xf32, #tpu.memory_space<vmem>>, vector<1x32xf32>
    %4 = vector.broadcast %3 : vector<1x32xf32> to vector<84x32xf32>
    %5 = arith.addf %2, %4 : vector<84x32xf32>
    %c0_5 = arith.constant 0 : index
    %c0_6 = arith.constant 0 : index
    %6 = vector.load %arg4[%c0_5, %c0_6] : memref<84x32xf32, #tpu.memory_space<vmem>>, vector<84x32xf32>
    tpu.vector_store %arg4[%c0_5, %c0_6], %5 {strides = array<i32>} : memref<84x32xf32, #tpu.memory_space<vmem>>, vector<84x32xf32>,
    return
  }
  func.func @transform_0(%arg0: i32) -> (i32, i32) {
    %c0_i32 = arith.constant 0 : i32
    %c0_i32_0 = arith.constant 0 : i32
    %c0_i32_1 = arith.constant 0 : i32
    return %c0_i32, %c0_i32_0 : i32, i32
  }
  func.func @transform_1(%arg0: i32) -> (i32, i32) {
    %c0_i32 = arith.constant 0 : i32
    %c0_i32_0 = arith.constant 0 : i32
    %c0_i32_1 = arith.constant 0 : i32
    return %c0_i32, %c0_i32_0 : i32, i32
  }
  func.func @transform_2(%arg0: i32) -> (i32, i32) {
    %c0_i32 = arith.constant 0 : i32
    %c0_i32_0 = arith.constant 0 : i32
    %c0_i32_1 = arith.constant 0 : i32
    return %c0_i32, %c0_i32_0 : i32, i32
  }
  func.func @transform_3(%arg0: i32) -> (i32, i32) {
    %c0_i32 = arith.constant 0 : i32
    %c0_i32_0 = arith.constant 0 : i32
    %c0_i32_1 = arith.constant 0 : i32
    return %c0_i32, %c0_i32_0 : i32, i32
  }
}

</mosaic_0001>

<bundles_post_ra>
// kernel: tpu_custom_call.1
= control target key start
LH: loop header
LB: loop body
LE: loop exit
PB: predicated region body
PF: predicated region fallthrough
CT: control target
= control target key end

     0   :  { %vm33_vm0 = vcmask 261120   ;;  %vm127_vm1 = vcmask 257024   ;;  %s279_s1 = inlined_call_operand.vmem [shape: f32[32,32], index: 1, kind: input, shape index: {}]   ;;  %s280_s0 = inlined_call_operand.vmem [shape: f32[84,32], index: 0, kind: input, shape index: {}]   ;;  %s281_s2 = inlined_call_operand.vmem [shape: f32[1,32], index: 2, kind: input, shape index: {}]   ;;  %s282_s3 = inlined_call_operand.vmem [shape: f32[84,32], index: 3, kind: output, shape index: {}]  }
   0x1   :  { %v28_v0 = vld [vmem:[%s279_s1 + $0x18] sm:$0xff]  ;;  %v27_v1 = vld [vmem:[%s279_s1 + $0x10] sm:$0xff]  ;;  %v26_v2 = vld [vmem:[%s279_s1 + $0x8] sm:$0xff] }
   0x2   :  { %145 = vmatpush.msra.mxu2 %v28_v0  ;;  %79 = vmatpush.msra.mxu0 %v28_v0  ;;  %v25_v3 = vld [vmem:[%s279_s1] sm:$0xff]  ;;  %v20_v4 = vld [vmem:[%s280_s0 + $0x30] sm:$0xff]  ;;  %v17_v6 = vld [vmem:[%s280_s0 + $0x18] sm:$0xff] }
   0x3   :  { %144 = vmatpush.msra.mxu1 %v28_v0  ;;  %146 = vmatpush.msra.mxu3 %v28_v0  ;;  %v14_v5 = vld [vmem:[%s280_s0] sm:$0xff]  ;;  %v23_v7 = vld [vmem:[%s280_s0 + $0x48] sm:$0xff]  ;;  %v21_v8 = vld [vmem:[%s280_s0 + $0x38] sm:$0xff] }
   0x4   :  { %148 = vmatpush.msra.mxu2 %v27_v1  ;;  %80 = vmatpush.msra.mxu0 %v27_v1  ;;  %v15_v9 = vld [vmem:[%s280_s0 + $0x8] sm:$0xff]  ;;  %v18_v10 = vld [vmem:[%s280_s0 + $0x20] sm:$0xff]  ;;  %v24_v11 = vld [vmem:[%s280_s0 + $0x50] sm:$0xf] }
   0x5   :  { %147 = vmatpush.msra.mxu1 %v27_v1  ;;  %149 = vmatpush.msra.mxu3 %v27_v1  ;;  %v22_v12 = vld [vmem:[%s280_s0 + $0x40] sm:$0xff]  ;;  %v16_v13 = vld [vmem:[%s280_s0 + $0x10] sm:$0xff]  ;;  %v19_v14 = vld [vmem:[%s280_s0 + $0x28] sm:$0xff] }
   0x6   :  { %151 = vmatpush.msra.mxu2 %v26_v2  ;;  %81 = vmatpush.msra.mxu0 %v26_v2  ;;  %v156_v15 = vld [vmem:[%s281_s2] ss:$0 sm:$0xff] }
   0x7   :  { %150 = vmatpush.msra.mxu1 %v26_v2  ;;  %152 = vmatpush.msra.mxu3 %v26_v2 }
   0x8   :  { %154 = vmatpush.msra.mxu2 %v25_v3  ;;  %82 = vmatpush.msra.mxu0 %v25_v3 }
   0x9   :  { %139 = vmatmul.msk.f32.vlgmr.msra.gmra.mxu2 %vm33_vm0, %v20_v4  ;;  %153 = vmatpush.msra.mxu1 %v25_v3 }
   0xa   :  { %133 = vmatmul.msk.f32.vlgmr.msra.gmra.mxu0 %vm33_vm0, %v14_v5  ;;  %136 = vmatmul.msk.f32.vlgmr.msra.gmra.mxu1 %vm33_vm0, %v17_v6 }
   0xb   :  { %155 = vmatpush.msra.mxu3 %v25_v3 }
   0xc   :  { %142 = vmatmul.msk.f32.vlgmr.msra.gmra.mxu3 %vm33_vm0, %v23_v7 }
  0x11   :  { %140 = vmatmul.msk.f32.gmra.mxu2 %vm33_vm0, %v21_v8 }
  0x12   :  { %134 = vmatmul.msk.f32.gmra.mxu0 %vm33_vm0, %v15_v9  ;;  %137 = vmatmul.msk.f32.gmra.mxu1 %vm33_vm0, %v18_v10 }
  0x14   :  { %143 = vmatmul.msk.f32.gmra.mxu3 %vm33_vm0, %v24_v11 }
  0x19   :  { %141 = vmatmul.msk.f32.gmra.mxu2 %vm33_vm0, %v22_v12 }
  0x1a   :  { %135 = vmatmul.msk.f32.gmra.mxu0 %vm33_vm0, %v16_v13  ;;  %138 = vmatmul.msk.f32.gmra.mxu1 %vm33_vm0, %v19_v14 }
  0x87   :  { %v84_v16 = vpop.f32.mrf.mxu0  ;;  %v93_v17 = vpop.f32.mrf.mxu1 }
  0x88   :  { %v85_v18 = vadd.f32 %v156_v15, %v84_v16  ;;  %v94_v19 = vadd.f32 %v156_v15, %v93_v17 }
  0x8a   :  { %117 = vst.msk [vmem:[%s282_s3] sm:$0xff] %vm33_vm0, %v85_v18 }
  0x8b   :  { %120 = vst.msk [vmem:[%s282_s3 + $0x18] sm:$0xff] %vm33_vm0, %v94_v19 }
  0x8c   :  { %v102_v20 = vpop.f32.mrf.mxu2 }
  0x8d   :  { %v103_v21 = vadd.f32 %v156_v15, %v102_v20 }
  0x8f   :  { %123 = vst.msk [vmem:[%s282_s3 + $0x30] sm:$0xff] %vm33_vm0, %v103_v21  ;;  %v87_v22 = vpop.f32.mrf.mxu0  ;;  %v96_v23 = vpop.f32.mrf.mxu1 }
  0x90   :  { %v88_v24 = vadd.f32 %v156_v15, %v87_v22  ;;  %v97_v25 = vadd.f32 %v156_v15, %v96_v23  ;;  %v111_v26 = vpop.f32.mrf.mxu3 }
  0x91   :  { %v112_v27 = vadd.f32 %v156_v15, %v111_v26 }
  0x92   :  { %118 = vst.msk [vmem:[%s282_s3 + $0x8] sm:$0xff] %vm33_vm0, %v88_v24 }
  0x93   :  { %121 = vst.msk [vmem:[%s282_s3 + $0x20] sm:$0xff] %vm33_vm0, %v97_v25 }
  0x94   :  { %v105_v28 = vpop.f32.mrf.mxu2  ;;  %126 = vst.msk [vmem:[%s282_s3 + $0x48] sm:$0xff] %vm33_vm0, %v112_v27 }
  0x95   :  { %v106_v29 = vadd.f32 %v156_v15, %v105_v28 }
  0x97   :  { %124 = vst.msk [vmem:[%s282_s3 + $0x38] sm:$0xff] %vm33_vm0, %v106_v29  ;;  %v90_v30 = vpop.f32.mrf.mxu0  ;;  %v99_v31 = vpop.f32.mrf.mxu1 }
  0x98   :  { %v91_v32 = vadd.f32 %v156_v15, %v90_v30  ;;  %v100_v33 = vadd.f32 %v156_v15, %v99_v31  ;;  %v114_v34 = vpop.f32.mrf.mxu3 }
  0x99   :  { %v115_v35 = vadd.f32 %v156_v15, %v114_v34 }
  0x9a   :  { %119 = vst.msk [vmem:[%s282_s3 + $0x10] sm:$0xff] %vm33_vm0, %v91_v32 }
  0x9b   :  { %122 = vst.msk [vmem:[%s282_s3 + $0x28] sm:$0xff] %vm33_vm0, %v100_v33 }
  0x9c   :  { %v108_v36 = vpop.f32.mrf.mxu2  ;;  %128 = vst.msk [vmem:[%s282_s3 + $0x50] sm:$0xf] %vm127_vm1, %v115_v35 }
  0x9d   :  { %v109_v37 = vadd.f32 %v156_v15, %v108_v36 }
  0x9f   :  { %125 = vst.msk [vmem:[%s282_s3 + $0x40] sm:$0xff] %vm33_vm0, %v109_v37 }

</bundles_post_ra>
